<compile_context>
chip_gen: v7x
topology: tpu7x:2x2x1
jax: 0.10.0
libtpu: 0.0.40
codegen_flags: <defaults>
</compile_context>

<pallas_src>
import math
from functools import partial

import jax
import jax.numpy as jnp
from jax.experimental import pallas as pl

BATCH = 2
HEADS = 4
LEN_Q = 8
LEN_K = 8
D_K = 8
D_V = 8

_MASK_FILL = -1.0e9   # user-mask fill value (matches torch masked_fill_)
_BLOCK_FILL = -2.0e9  # structural cross-(batch, head) fill; strictly below the user
                      # fill so fully-masked rows stay confined to their own block


def _sdpa_kernel(q_ref, k_ref, v_ref, sel_ref, bias_ref, ctx_ref, attn_ref, *,
                 inv_scale):
    """Fused SDPA over all (batch, head) pairs with three MXU matmuls.

    q_ref: (R, d_k), k_ref/v_ref: (C, d_k)/(C, d_v), bias_ref: (R, C),
    sel_ref: (C, Lk) block-diagonal extraction matrix, R = B*H*Lq, C = B*H*Lk.
    """
    # scores[r, c] = <q[r, :], k[c, :]> / sqrt(d_k) + bias[r, c]   (one MXU push)
    scores = jax.lax.dot_general(
        q_ref[...], k_ref[...], (((1,), (1,)), ((), ())),
        preferred_element_type=jnp.float32) * inv_scale + bias_ref[...]
    # Numerically stable softmax over the fused key axis. Off-block entries carry
    # a -2e9 bias, so exp underflows to exactly 0 and each row reduces to its own
    # per-(batch, head) softmax -- no cross-head/cross-batch leakage.
    scores = scores - jnp.max(scores, axis=-1, keepdims=True)
    p = jnp.exp(scores)
    p = p / jnp.sum(p, axis=-1, keepdims=True)      # exact divide (torch parity)
    # context = p @ v  (off-block p entries are exactly 0)
    ctx_ref[...] = jnp.dot(p, v_ref[...],
                           preferred_element_type=jnp.float32).astype(ctx_ref.dtype)
    # attn[r, k] = p[r, block(r)*Lk + k]  via selection matmul (no in-kernel slicing)
    attn_ref[...] = jnp.dot(p, sel_ref[...],
                            preferred_element_type=jnp.float32).astype(attn_ref.dtype)


def scaled_dot_product_attention(query, key, value, mask=None):
    """query/key: (B, H, Lq/Lk, d_k), value: (B, H, Lk, d_v),
    mask: broadcastable to (B, H, Lq, Lk), truthy == mask out (or None).
    Returns (context (B, H, Lq, d_v), attn (B, H, Lq, Lk))."""
    B, H, Lq, dk = query.shape
    Lk = key.shape[2]
    dv = value.shape[3]
    BH = B * H
    R, C = BH * Lq, BH * Lk
    inv_scale = 1.0 / math.sqrt(dk)

    # Fold batch & heads into the row axis (free, row-major reshapes).
    q2 = query.reshape(R, dk)
    k2 = key.reshape(C, dk)
    v2 = value.reshape(C, dv)

    # Additive bias: -2e9 on cross-(batch, head) entries, -1e9 (torch's
    # masked_fill_ value) on user-masked in-block entries, 0 elsewhere.
    # TODO(synk): if a row is fully user-masked, torch returns uniform 1/Lk
    #             weights; the additive bias instead yields a softmax of the raw
    #             scores within that (still correct) block.
    eye = jnp.eye(BH, dtype=jnp.float32)
    bias = jnp.broadcast_to(((1.0 - eye) * _BLOCK_FILL)[:, None, :, None],
                            (BH, Lq, BH, Lk))
    if mask is not None:
        m = jnp.broadcast_to(mask != 0, (B, H, Lq, Lk)).reshape(BH, Lq, Lk)
        user = jnp.where(m, _MASK_FILL, 0.0).astype(jnp.float32)
        bias = bias + jnp.einsum("ij,iqk->iqjk", eye, user)
    bias = bias.reshape(R, C)

    # Block-diagonal extraction matrix: sel[c, k] = 1 iff (c mod Lk) == k.
    sel = jnp.tile(jnp.eye(Lk, dtype=jnp.float32), (BH, 1))          # (C, Lk)

    ctx_flat, attn_flat = pl.pallas_call(
        partial(_sdpa_kernel, inv_scale=inv_scale),
        # Gridless: the whole problem (<32 KiB) lives in VMEM as one block.
        out_shape=(jax.ShapeDtypeStruct((R, dv), query.dtype),
                   jax.ShapeDtypeStruct((R, Lk), jnp.float32)),
    )(q2, k2, v2, sel, bias)

    return ctx_flat.reshape(B, H, Lq, dv), attn_flat.reshape(B, H, Lq, Lk)


def _reference(query, key, value, mask=None):
    d_k = query.shape[-1]
    scores = jnp.einsum("bhqd,bhkd->bhqk", query, key) / math.sqrt(d_k)
    if mask is not None:
        scores = jnp.where(jnp.broadcast_to(mask != 0, scores.shape),
                           _MASK_FILL, scores)
    p = jax.nn.softmax(scores, axis=-1)
    ctx = jnp.einsum("bhqk,bhkd->bhqd", p, value)
    return ctx, p


if __name__ == "__main__":
    root = jax.random.PRNGKey(0)
    kq, kk, kv = jax.random.split(root, 3)
    q = jax.random.normal(kq, (BATCH, HEADS, LEN_Q, D_K), jnp.float32)
    k = jax.random.normal(kk, (BATCH, HEADS, LEN_K, D_K), jnp.float32)
    v = jax.random.normal(kv, (BATCH, HEADS, LEN_K, D_V), jnp.float32)

    # Boolean key-padding mask, broadcastable to (B, H, Lq, Lk) exactly like
    # torch's masked_fill_: batch 1 masks its last two key positions.
    mask = jnp.zeros((BATCH, 1, 1, LEN_K), jnp.bool_).at[1, :, :, LEN_K - 2:].set(True)

    sdpa = jax.jit(scaled_dot_product_attention)
    ctx, attn = sdpa(q, k, v, mask)
    jax.block_until_ready((ctx, attn))

    ref_ctx, ref_attn = _reference(q, k, v, mask)
    assert ctx.shape == (BATCH, HEADS, LEN_Q, D_V)
    assert attn.shape == (BATCH, HEADS, LEN_Q, LEN_K)
    assert jnp.allclose(ctx, ref_ctx, atol=1e-4, rtol=1e-4)
    assert jnp.allclose(attn, ref_attn, atol=1e-4, rtol=1e-4)
    # Attention rows must sum to 1 -> no cross-(batch, head) probability leak.
    assert jnp.allclose(attn.sum(-1), 1.0, atol=1e-5)
    print("KERNEL_OK")
</pallas_src>

<mosaic_0001>
module attributes {stable_mosaic.version = 11 : i64} {
  func.func @_sdpa_kernel(%arg0: memref<64x8xf32, #tpu.memory_space<vmem>>, %arg1: memref<64x8xf32, #tpu.memory_space<vmem>>, %arg2: memref<64x8xf32, #tpu.memory_space<vmem>>, %arg3: memref<64x8xf32, #tpu.memory_space<vmem>>, %arg4: memref<64x64xf32, #tpu.memory_space<vmem>>, %arg5: memref<64x8xf32, #tpu.memory_space<vmem>>, %arg6: memref<64x8xf32, #tpu.memory_space<vmem>>) attributes {dimension_semantics = [], scalar_prefetch = 0 : i64, scratch_operands = 0 : i64, tpu.core_type = #tpu.core_type<tc>} {
    %c0 = arith.constant 0 : index
    %c0_0 = arith.constant 0 : index
    %0 = vector.load %arg0[%c0, %c0_0] : memref<64x8xf32, #tpu.memory_space<vmem>>, vector<64x8xf32>
    %c0_1 = arith.constant 0 : index
    %c0_2 = arith.constant 0 : index
    %1 = vector.load %arg1[%c0_1, %c0_2] : memref<64x8xf32, #tpu.memory_space<vmem>>, vector<64x8xf32>
    %cst = arith.constant dense<0.000000e+00> : vector<64x64xf32>
    %2 = tpu.matmul %0, %1, %cst {dimension_numbers = #tpu.dot_dimension_numbers<[1], [1], [0], [0], [0, 0, 1, 0], [], []>} : vector<64x8xf32>, vector<64x8xf32>, vector<64x64xf32> -> vector<64x64xf32>
    %cst_3 = arith.constant 0.353553385 : f32
    %3 = vector.broadcast %cst_3 : f32 to vector<64x64xf32>
    %4 = arith.mulf %2, %3 : vector<64x64xf32>
    %c0_4 = arith.constant 0 : index
    %c0_5 = arith.constant 0 : index
    %5 = vector.load %arg4[%c0_4, %c0_5] : memref<64x64xf32, #tpu.memory_space<vmem>>, vector<64x64xf32>
    %6 = arith.addf %4, %5 : vector<64x64xf32>
    %cst_6 = arith.constant dense<0xFF800000> : vector<64xf32>
    %7 = vector.multi_reduction <maximumf>, %6, %cst_6 [1] : vector<64x64xf32> to vector<64xf32>
    %8 = vector.shape_cast %7 : vector<64xf32> to vector<64x1xf32>
    %9 = vector.broadcast %8 : vector<64x1xf32> to vector<64x64xf32>
    %10 = arith.subf %6, %9 : vector<64x64xf32>
    %11 = math.exp %10 : vector<64x64xf32>
    %cst_7 = arith.constant dense<0.000000e+00> : vector<64xf32>
    %12 = vector.multi_reduction <add>, %11, %cst_7 [1] : vector<64x64xf32> to vector<64xf32>
    %13 = vector.shape_cast %12 : vector<64xf32> to vector<64x1xf32>
    %14 = vector.broadcast %13 : vector<64x1xf32> to vector<64x64xf32>
    %15 = arith.divf %11, %14 : vector<64x64xf32>
    %c0_8 = arith.constant 0 : index
    %c0_9 = arith.constant 0 : index
    %16 = vector.load %arg2[%c0_8, %c0_9] : memref<64x8xf32, #tpu.memory_space<vmem>>, vector<64x8xf32>
    %cst_10 = arith.constant dense<0.000000e+00> : vector<64x8xf32>
    %17 = tpu.matmul %15, %16, %cst_10 {dimension_numbers = #tpu.dot_dimension_numbers<[1], [0], [0], [1], [0, 0, 1, 1], [], []>} : vector<64x64xf32>, vector<64x8xf32>, vector<64x8xf32> -> vector<64x8xf32>
    %c0_11 = arith.constant 0 : index
    %c0_12 = arith.constant 0 : index
    %18 = vector.load %arg5[%c0_11, %c0_12] : memref<64x8xf32, #tpu.memory_space<vmem>>, vector<64x8xf32>
    tpu.vector_store %arg5[%c0_11, %c0_12], %17 {strides = array<i32>} : memref<64x8xf32, #tpu.memory_space<vmem>>, vector<64x8xf32>,
    %c0_13 = arith.constant 0 : index
    %c0_14 = arith.constant 0 : index
    %19 = vector.load %arg3[%c0_13, %c0_14] : memref<64x8xf32, #tpu.memory_space<vmem>>, vector<64x8xf32>
    %cst_15 = arith.constant dense<0.000000e+00> : vector<64x8xf32>
    %20 = tpu.matmul %15, %19, %cst_15 {dimension_numbers = #tpu.dot_dimension_numbers<[1], [0], [0], [1], [0, 0, 1, 1], [], []>} : vector<64x64xf32>, vector<64x8xf32>, vector<64x8xf32> -> vector<64x8xf32>
    %c0_16 = arith.constant 0 : index
    %c0_17 = arith.constant 0 : index
    %21 = vector.load %arg6[%c0_16, %c0_17] : memref<64x8xf32, #tpu.memory_space<vmem>>, vector<64x8xf32>
    tpu.vector_store %arg6[%c0_16, %c0_17], %20 {strides = array<i32>} : memref<64x8xf32, #tpu.memory_space<vmem>>, vector<64x8xf32>,
    return
  }
}

</mosaic_0001>

<bundles_post_ra>
// kernel: scaled_dot_product_attention.1
= control target key start
LH: loop header
LB: loop body
LE: loop exit
PB: predicated region body
PF: predicated region fallthrough
CT: control target
= control target key end

     0   :  { %12 = vsyncpa [#allocation3], 0  ;;  %vm40_vm0 = vcmask 64512   ;;  %s1208_s0 = inlined_call_operand.vmem [shape: f32[64,8], index: 0, kind: input, shape index: {}]   ;;  %s1209_s1 = inlined_call_operand.vmem [shape: f32[64,8], index: 1, kind: input, shape index: {}]   ;;  %s1210_s2 = inlined_call_operand.vmem [shape: f32[64,8], index: 2, kind: input, shape index: {}]   ;;  %s1211_s3 = inlined_call_operand.vmem [shape: f32[64,8], index: 3, kind: input, shape index: {}]   ;;  %s1212_s4 = inlined_call_operand.vmem [shape: f32[64,64], index: 4, kind: input, shape index: {}]   ;;  %s1213_s5 = inlined_call_operand.hbm [shape: f32[64,8], index: 5, kind: output, shape index: {0}]   ;;  %s1214_s6 = inlined_call_operand.hbm [shape: f32[64,8], index: 6, kind: output, shape index: {1}]  }
   0x1   :  { %v32_v0 = vld [vmem:[%s1209_s1] sm:$0xff]  ;;  %v33_v1 = vld [vmem:[%s1209_s1 + $0x8] sm:$0xff]  ;;  %v34_v2 = vld [vmem:[%s1209_s1 + $0x10] sm:$0xff] }
   0x2   :  { %v769_v3 = vpack.c.bf16 %v33_v1, %v32_v0  ;;  %vm959_vm1 = vmpackc.low %vm40_vm0, %vm40_vm0  ;;  %v35_v5 = vld [vmem:[%s1209_s1 + $0x18] sm:$0xff]  ;;  %v24_v7 = vld [vmem:[%s1208_s0] sm:$0xff] }
   0x3   :  { %v775_v6 = vpack.c.bf16 %v35_v5, %v34_v2  ;;  %701 = vmatprep.mubr.msk.f32.mxu0 %vm40_vm0, %v24_v7 }
   0x4   :  { %771 = vmatprep.subr.msk.bf16.mxu0 %vm959_vm1, %v769_v3 }
   0x5   :  { %774 = vmatpush3.bf16.xpose.msk.msra.mxu0 %vm959_vm1, %v769_v3 }
   0x6   :  { %777 = vmatprep.subr.msk.bf16.mxu0 %vm959_vm1, %v775_v6 }
   0x7   :  { %13 = vsyncpa [#allocation5], 0  ;;  %v36_v8 = vld [vmem:[%s1209_s1 + $0x20] sm:$0xff]  ;;  %v37_v9 = vld [vmem:[%s1209_s1 + $0x28] sm:$0xff]  ;;  %vm218_vm2 = vcmask 523264  }
   0x8   :  { %v781_v10 = vpack.c.bf16 %v37_v9, %v36_v8  ;;  %v38_v11 = vld [vmem:[%s1209_s1 + $0x30] sm:$0xff]  ;;  %v39_v12 = vld [vmem:[%s1209_s1 + $0x38] sm:$0xff]  ;;  %v25_v14 = vld [vmem:[%s1208_s0 + $0x8] sm:$0xff] }
   0x9   :  { %v787_v13 = vpack.c.bf16 %v39_v12, %v38_v11  ;;  %v26_v15 = vld [vmem:[%s1208_s0 + $0x10] sm:$0xff]  ;;  %v27_v16 = vld [vmem:[%s1208_s0 + $0x18] sm:$0xff]  ;;  %v28_v17 = vld [vmem:[%s1208_s0 + $0x20] sm:$0xff] }
   0xa   :  { %v29_v18 = vld [vmem:[%s1208_s0 + $0x28] sm:$0xff]  ;;  %v30_v19 = vld [vmem:[%s1208_s0 + $0x30] sm:$0xff]  ;;  %v31_v20 = vld [vmem:[%s1208_s0 + $0x38] sm:$0xff] }
   0xb   :  { %v202_v23 = vld [vmem:[%s1212_s4] sm:$0xff]  ;;  %v203_v26 = vld [vmem:[%s1212_s4 + $0x8] sm:$0xff]  ;;  %v204_v31 = vld [vmem:[%s1212_s4 + $0x10] sm:$0xff] }
   0xc   :  { %v205_v35 = vld [vmem:[%s1212_s4 + $0x18] sm:$0xff]  ;;  %v206_v40 = vld [vmem:[%s1212_s4 + $0x20] sm:$0xff]  ;;  %v207_v45 = vld [vmem:[%s1212_s4 + $0x28] sm:$0xff] }
   0xd   :  { %780 = vmatpush3.bf16.xpose.msk.msra.mxu0 %vm959_vm1, %v775_v6  ;;  %v208_v49 = vld [vmem:[%s1212_s4 + $0x30] sm:$0xff]  ;;  %v209_v55 = vld [vmem:[%s1212_s4 + $0x38] sm:$0xff] }
   0xe   :  { %783 = vmatprep.subr.msk.bf16.mxu0 %vm959_vm1, %v781_v10 }
  0x15   :  { %786 = vmatpush3.bf16.xpose.msk.msra.mxu0 %vm959_vm1, %v781_v10 }
  0x16   :  { %789 = vmatprep.subr.msk.bf16.mxu0 %vm959_vm1, %v787_v13 }
  0x1d   :  { %792 = vmatpush3.bf16.xpose.msk.msra.mxu0 %vm959_vm1, %v787_v13 }
  0x24   :  { %702 = vmatmul.mubr.msk.f32.vlgmr.msra.gmra.mrb[0].mxu0 %vm40_vm0, %v25_v14 }
  0x25   :  { %704 = vmatprep.mubr.msk.f32.mxu0 %vm40_vm0, %v26_v15 }
  0x28   :  { %705 = vmatmul.mubr.msk.f32.gmra.mrb[2].mxu0 %vm40_vm0, %v27_v16 }
  0x29   :  { %707 = vmatprep.mubr.msk.f32.mxu0 %vm40_vm0, %v28_v17 }
  0x2c   :  { %708 = vmatmul.mubr.msk.f32.gmra.mrb[4].mxu0 %vm40_vm0, %v29_v18 }
  0x2d   :  { %710 = vmatprep.mubr.msk.f32.mxu0 %vm40_vm0, %v30_v19 }
  0x30   :  { %711 = vmatmul.mubr.msk.f32.gmra.mrb[6].mxu0 %vm40_vm0, %v31_v20 }
  0xf7   :  { %v703_v21 = vpop.f32.mrb[0].mxu0 }
  0xf8   :  { %v155_v22 = vpop.f32.mrb[1].mxu0  ;;  %v195_v24 = vmul.f32 0.35355338, %v703_v21 }
  0xf9   :  { %v194_v25 = vmul.f32 0.35355338, %v155_v22 }
  0xfa   :  { %v211_v34 = vadd.f32 %v203_v26, %v195_v24 }
  0xfb   :  { %v706_v27 = vpop.f32.mrb[2].mxu0  ;;  %v210_v28 = vadd.f32 %v202_v23, %v194_v25 }
  0xfc   :  { %v197_v29 = vmul.f32 0.35355338, %v706_v27  ;;  %v165_v30 = vpop.f32.mrb[3].mxu0  ;;  %v222_v43 = vsel %vm218_vm2, %v211_v34, -inf }
  0xfd   :  { %v196_v32 = vmul.f32 0.35355338, %v165_v30  ;;  %v219_v33 = vsel %vm218_vm2, %v210_v28, -inf }
  0xfe   :  { %220 = vmax.xlane.f32.xlu0 %v219_v33  ;;  %v213_v39 = vadd.f32 %v205_v35, %v197_v29  ;;  %v307_v35 = vld [vmem:[%s1210_s2] sm:$0xff] }
  0xff   :  { %v709_v36 = vpop.f32.mrb[4].mxu0  ;;  %v212_v37 = vadd.f32 %v204_v31, %v196_v32 }
 0x100   :  { %v175_v38 = vpop.f32.mrb[5].mxu0  ;;  %v199_v41 = vmul.f32 0.35355338, %v709_v36  ;;  %v228_v50 = vsel %vm218_vm2, %v213_v39, -inf  ;;  %v308_v36 = vld [vmem:[%s1210_s2 + $0x8] sm:$0xff] }
 0x101   :  { %v198_v42 = vmul.f32 0.35355338, %v175_v38  ;;  %v225_v44 = vsel %vm218_vm2, %v212_v37, -inf  ;;  %v793_v38 = vpack.c.bf16 %v308_v36, %v307_v35 }
 0x102   :  { %223 = vmax.xlane.f32.xlu0 %v222_v43  ;;  %226 = vmax.xlane.f32.xlu1 %v225_v44  ;;  %v215_v54 = vadd.f32 %v207_v45, %v199_v41  ;;  %v310_v41 = vld [vmem:[%s1210_s2 + $0x18] sm:$0xff]  ;;  %v311_v43 = vld [vmem:[%s1210_s2 + $0x20] sm:$0xff]  ;;  %v312_v44 = vld [vmem:[%s1210_s2 + $0x28] sm:$0xff] }
 0x103   :  { %v712_v46 = vpop.f32.mrb[6].mxu0  ;;  %v214_v47 = vadd.f32 %v206_v40, %v198_v42  ;;  %794 = vmatprep.subr.bf16.mxu1 %v793_v38  ;;  %v309_v40 = vld [vmem:[%s1210_s2 + $0x10] sm:$0xff]  ;;  %v801_v45 = vpack.c.bf16 %v312_v44, %v311_v43 }
 0x104   :  { %v185_v48 = vpop.f32.mrb[7].mxu0  ;;  %v201_v51 = vmul.f32 0.35355338, %v712_v46  ;;  %v234_v57 = vsel %vm218_vm2, %v215_v54, -inf  ;;  %796 = vmatpush3.bf16.msra.mxu1 %v793_v38  ;;  %v797_v42 = vpack.c.bf16 %v310_v41, %v309_v40  ;;  %v313_v46 = vld [vmem:[%s1210_s2 + $0x30] sm:$0xff] }
 0x105   :  { %v200_v52 = vmul.f32 0.35355338, %v185_v48  ;;  %v231_v53 = vsel %vm218_vm2, %v214_v47, -inf }
 0x106   :  { %229 = vmax.xlane.f32.xlu1 %v228_v50  ;;  %232 = vmax.xlane.f32.xlu0 %v231_v53  ;;  %v217_v59 = vadd.f32 %v209_v55, %v201_v51  ;;  %v453_v50 = vld [vmem:[%s1211_s3 + $0x8] sm:$0xff] }
 0x107   :  { %v216_v56 = vadd.f32 %v208_v49, %v200_v52  ;;  %798 = vmatprep.subr.bf16.mxu1 %v797_v42  ;;  %v452_v49 = vld [vmem:[%s1211_s3] sm:$0xff] }
 0x108   :  { %v240_v60 = vsel %vm218_vm2, %v217_v59, -inf  ;;  %800 = vmatpush3.bf16.msra.mxu1 %v797_v42  ;;  %v809_v51 = vpack.c.bf16 %v453_v50, %v452_v49 }
 0x109   :  { %v237_v58 = vsel %vm218_vm2, %v216_v56, -inf  ;;  %802 = vmatprep.subr.bf16.mxu1 %v801_v45 }
 0x10a   :  { %235 = vmax.xlane.f32.xlu1 %v234_v57  ;;  %238 = vmax.xlane.f32.xlu0 %v237_v58 }
 0x10c   :  { %804 = vmatpush3.bf16.msra.mxu1 %v801_v45 }
 0x10e   :  { %241 = vmax.xlane.f32.xlu1 %v240_v60 }
 0x18b   :  { %v221_v61 = vpop.xlane.xlu0 %220 }
 0x18c   :  { %v243_v62 = vsub.f32 %v210_v28, %v221_v61  ;;  %v454_v61 = vld [vmem:[%s1211_s3 + $0x10] sm:$0xff] }
 0x18e   :  { %v251_v63 = vmul.f32 1.442695, %v243_v62  ;;  %v455_v62 = vld [vmem:[%s1211_s3 + $0x18] sm:$0xff] }
 0x18f   :  { %v224_v0 = vpop.xlane.xlu0 %223  ;;  %v227_v1 = vpop.xlane.xlu1 %226 }
 0x190   :  { %829 = vpow2.f32 %v251_v63  ;;  %v244_v2 = vsub.f32 %v211_v34, %v224_v0  ;;  %v245_v3 = vsub.f32 %v212_v37, %v227_v1 }
 0x192   :  { %v253_v4 = vmul.f32 1.442695, %v244_v2  ;;  %v255_v5 = vmul.f32 1.442695, %v245_v3  ;;  %v813_v3 = vpack.c.bf16 %v455_v62, %v454_v61 }
 0x193   :  { %v230_v6 = vpop.xlane.xlu1 %229  ;;  %v233_v7 = vpop.xlane.xlu0 %232 }
 0x194   :  { %831 = vpow2.f32 %v253_v4  ;;  %v246_v8 = vsub.f32 %v213_v39, %v230_v6  ;;  %v247_v9 = vsub.f32 %v214_v47, %v233_v7  ;;  %v314_v47 = vld [vmem:[%s1210_s2 + $0x38] sm:$0xff]  ;;  %v457_v6 = vld [vmem:[%s1211_s3 + $0x28] sm:$0xff] }
 0x195   :  { %833 = vpow2.f32 %v255_v5  ;;  %v805_v48 = vpack.c.bf16 %v314_v47, %v313_v46  ;;  %v456_v5 = vld [vmem:[%s1211_s3 + $0x20] sm:$0xff] }
 0x196   :  { %v257_v10 = vmul.f32 1.442695, %v246_v8  ;;  %v259_v11 = vmul.f32 1.442695, %v247_v9 }
 0x197   :  { %v236_v12 = vpop.xlane.xlu1 %235  ;;  %v239_v13 = vpop.xlane.xlu0 %238  ;;  %806 = vmatprep.subr.bf16.mxu1 %v805_v48 }
 0x198   :  { %835 = vpow2.f32 %v257_v10  ;;  %v248_v14 = vsub.f32 %v215_v54, %v236_v12  ;;  %v249_v15 = vsub.f32 %v216_v56, %v239_v13  ;;  %808 = vmatpush3.bf16.msra.mxu1 %v805_v48  ;;  %v817_v10 = vpack.c.bf16 %v457_v6, %v456_v5  ;;  %v458_v12 = vld [vmem:[%s1211_s3 + $0x30] sm:$0xff]  ;;  %v459_v13 = vld [vmem:[%s1211_s3 + $0x38] sm:$0xff]  ;;  %s909_s3 = smov [#allocation2]  }
 0x199   :  { %837 = vpow2.f32 %v259_v11  ;;  %810 = vmatprep.subr.bf16.mxu1 %v809_v51  ;;  %s578_s21 = sshll.u32 %s909_s3, 4  ;;  %s579_s21 = int_to_ptr.vmem [resolvable:$true] %s578_s21 }
 0x19a   :  { %v1058_v16 = vpop.eup %829  ;;  %v261_v17 = vmul.f32 1.442695, %v248_v14  ;;  %v263_v18 = vmul.f32 1.442695, %v249_v15  ;;  %s861_s22 = scalar_lea.vmem %s579_s21, 1024  ;;  %p866_p1 = scmp.lt.s32.totalorder %s579_s21, %s579_s21 }
 0x19b   :  { %v242_v19 = vpop.xlane.xlu1 %241  ;;  %v267_v20 = vsel %vm218_vm2, %v1058_v16, 0.0  ;;  %p862_p0 = scmp.ne.s32.totalorder %s579_s21, %s861_s22  ;;  %p867_p2 = scmp.lt.s32.totalorder %s861_s22, %s861_s22 }
 0x19c   :  { %839 = vpow2.f32 %v261_v17  ;;  %v250_v21 = vsub.f32 %v217_v59, %v242_v19  ;;  %268 = vadd.xlane.f32.xlu0 %v267_v20  ;;  %v821_v17 = vpack.c.bf16 %v459_v13, %v458_v12 }
 0x19d   :  { %841 = vpow2.f32 %v263_v18  ;;  %p868_p3 = por %p867_p2, %p866_p1 }
 0x19e   :  { %v1062_v22 = vpop.eup %831  ;;  %v265_v23 = vmul.f32 1.442695, %v250_v21 }
 0x19f   :  { %v1064_v24 = vpop.eup %833  ;;  %v270_v25 = vsel %vm218_vm2, %v1062_v22, 0.0  ;;  %p869_p4 = pnand %p868_p3, %p862_p0 }
 0x1a0   :  { %843 = vpow2.f32 %v265_v23  ;;  %271 = vadd.xlane.f32.xlu1 %v270_v25  ;;  %v273_v26 = vsel %vm218_vm2, %v1064_v24, 0.0 }
 0x1a1   :  { %274 = vadd.xlane.f32.xlu0 %v273_v26 }
 0x1a2   :  { %v1070_v27 = vpop.eup %835 }
 0x1a3   :  { %v1072_v28 = vpop.eup %837  ;;  %v276_v29 = vsel %vm218_vm2, %v1070_v27, 0.0 }
 0x1a4   :  { %277 = vadd.xlane.f32.xlu1 %v276_v29  ;;  %v279_v30 = vsel %vm218_vm2, %v1072_v28, 0.0 }
 0x1a5   :  { %280 = vadd.xlane.f32.xlu0 %v279_v30 }
 0x1a6   :  { %v1078_v31 = vpop.eup %839 }
 0x1a7   :  { %v1080_v32 = vpop.eup %841  ;;  %v282_v33 = vsel %vm218_vm2, %v1078_v31, 0.0 }
 0x1a8   :  { %283 = vadd.xlane.f32.xlu1 %v282_v33  ;;  %v285_v34 = vsel %vm218_vm2, %v1080_v32, 0.0 }
 0x1a9   :  { %286 = vadd.xlane.f32.xlu0 %v285_v34 }
 0x1aa   :  { %v1092_v37 = vpop.eup %843 }
 0x1ab   :  { %v288_v39 = vsel %vm218_vm2, %v1092_v37, 0.0 }
 0x1ac   :  { %289 = vadd.xlane.f32.xlu1 %v288_v39 }
 0x229   :  { %v269_v52 = vpop.xlane.xlu0 %268 }
 0x22a   :  { %845 = vrcp.f32 %v269_v52 }
 0x22d   :  { %v272_v53 = vpop.xlane.xlu1 %271 }
 0x22e   :  { %847 = vrcp.f32 %v272_v53  ;;  %v275_v54 = vpop.xlane.xlu0 %274 }
 0x22f   :  { %849 = vrcp.f32 %v275_v54 }
 0x231   :  { %v278_v55 = vpop.xlane.xlu1 %277 }
 0x232   :  { %851 = vrcp.f32 %v278_v55  ;;  %v281_v56 = vpop.xlane.xlu0 %280 }
 0x233   :  { %853 = vrcp.f32 %v281_v56 }
 0x234   :  { %v846_v57 = vpop.eup %845 }
 0x235   :  { %v284_v58 = vpop.xlane.xlu1 %283  ;;  %v292_v59 = vmul.f32 %v846_v57, %v1058_v16 }
 0x236   :  { %855 = vrcp.f32 %v284_v58  ;;  %v287_v60 = vpop.xlane.xlu0 %286 }
 0x237   :  { %857 = vrcp.f32 %v287_v60  ;;  %729 = vmatprep.mubr.msk.f32.mxu1 %vm218_vm2, %v292_v59 }
 0x238   :  { %v848_v63 = vpop.eup %847 }
 0x239   :  { %v850_v0 = vpop.eup %849  ;;  %v290_v1 = vpop.xlane.xlu1 %289  ;;  %v294_v2 = vmul.f32 %v848_v63, %v1062_v22 }
 0x23a   :  { %859 = vrcp.f32 %v290_v1  ;;  %v296_v4 = vmul.f32 %v850_v0, %v1064_v24 }
 0x23b   :  { %730 = vmatmul.mubr.msk.f32.vlgmr.msra.gmra.mrb[0].mxu1 %vm218_vm2, %v294_v2 }
 0x23c   :  { %v852_v7 = vpop.eup %851  ;;  %812 = vmatpush3.bf16.msra.mxu1 %v809_v51  ;;  %732 = vmatprep.mubr.msk.f32.mxu1 %vm218_vm2, %v296_v4 }
 0x23d   :  { %v854_v8 = vpop.eup %853  ;;  %814 = vmatprep.subr.bf16.mxu1 %v813_v3  ;;  %v298_v9 = vmul.f32 %v852_v7, %v1070_v27 }
 0x23e   :  { %v300_v11 = vmul.f32 %v854_v8, %v1072_v28 }
 0x23f   :  { %733 = vmatmul.mubr.msk.f32.gmra.mrb[2].mxu1 %vm218_vm2, %v298_v9 }
 0x240   :  { %v856_v14 = vpop.eup %855  ;;  %816 = vmatpush3.bf16.msra.mxu1 %v813_v3  ;;  %735 = vmatprep.mubr.msk.f32.mxu1 %vm218_vm2, %v300_v11 }
 0x241   :  { %v858_v15 = vpop.eup %857  ;;  %818 = vmatprep.subr.bf16.mxu1 %v817_v10  ;;  %v302_v16 = vmul.f32 %v856_v14, %v1078_v31 }
 0x242   :  { %v304_v18 = vmul.f32 %v858_v15, %v1080_v32 }
 0x243   :  { %736 = vmatmul.mubr.msk.f32.gmra.mrb[4].mxu1 %vm218_vm2, %v302_v16 }
 0x244   :  { %v860_v19 = vpop.eup %859  ;;  %820 = vmatpush3.bf16.msra.mxu1 %v817_v10  ;;  %738 = vmatprep.mubr.msk.f32.mxu1 %vm218_vm2, %v304_v18 }
 0x245   :  { %822 = vmatprep.subr.bf16.mxu1 %v821_v17  ;;  %v306_v20 = vmul.f32 %v860_v19, %v1092_v37 }
 0x247   :  { %739 = vmatmul.mubr.msk.f32.gmra.mrb[6].mxu1 %vm218_vm2, %v306_v20 }
 0x248   :  { %824 = vmatpush3.bf16.msra.mxu1 %v821_v17  ;;  %757 = vmatprep.mubr.msk.f32.mxu1 %vm218_vm2, %v292_v59 }
 0x24b   :  { %758 = vmatmul.mubr.msk.f32.vlgmr.msra.gmra.mrb[8].mxu1 %vm218_vm2, %v294_v2 }
 0x24c   :  { %760 = vmatprep.mubr.msk.f32.mxu1 %vm218_vm2, %v296_v4 }
 0x24f   :  { %761 = vmatmul.mubr.msk.f32.gmra.mrb[10].mxu1 %vm218_vm2, %v298_v9 }
 0x250   :  { %763 = vmatprep.mubr.msk.f32.mxu1 %vm218_vm2, %v300_v11 }
 0x253   :  { %764 = vmatmul.mubr.msk.f32.gmra.mrb[12].mxu1 %vm218_vm2, %v302_v16 }
 0x254   :  { %766 = vmatprep.mubr.msk.f32.mxu1 %vm218_vm2, %v304_v18 }
 0x257   :  { %767 = vmatmul.mubr.msk.f32.gmra.mrb[14].mxu1 %vm218_vm2, %v306_v20 }
 0x30e   :  { %v731_v21 = vpop.f32.mrb[0].mxu1 }
 0x30f   :  { %445 = vst.msk [vmem:[#allocation2 + $0x8] sm:$0xff] %vm40_vm0, %v731_v21  ;;  %v405_v22 = vpop.f32.mrb[1].mxu1 }
 0x310   :  { %444 = vst.msk [vmem:[#allocation2] sm:$0xff] %vm40_vm0, %v405_v22 }
 0x312   :  { %v734_v23 = vpop.f32.mrb[2].mxu1 }
 0x313   :  { %447 = vst.msk [vmem:[#allocation2 + $0x18] sm:$0xff] %vm40_vm0, %v734_v23  ;;  %v415_v24 = vpop.f32.mrb[3].mxu1 }
 0x314   :  { %446 = vst.msk [vmem:[#allocation2 + $0x10] sm:$0xff] %vm40_vm0, %v415_v24 }
 0x316   :  { %v737_v25 = vpop.f32.mrb[4].mxu1 }
 0x317   :  { %449 = vst.msk [vmem:[#allocation2 + $0x28] sm:$0xff] %vm40_vm0, %v737_v25  ;;  %v425_v26 = vpop.f32.mrb[5].mxu1 }
 0x318   :  { %448 = vst.msk [vmem:[#allocation2 + $0x20] sm:$0xff] %vm40_vm0, %v425_v26 }
 0x31a   :  { %v740_v27 = vpop.f32.mrb[6].mxu1 }
 0x31b   :  { %451 = vst.msk [vmem:[#allocation2 + $0x38] sm:$0xff] %vm40_vm0, %v740_v27  ;;  %v435_v28 = vpop.f32.mrb[7].mxu1 }
 0x31c   :  { %450 = vst.msk [vmem:[#allocation2 + $0x30] sm:$0xff] %vm40_vm0, %v435_v28 }
 0x31d   :  { %872 = shalt.err (!%p869_p4)
}
 0x31e   :  { %s873_s25 = scalar_lea.hbm %s1213_s5, 1024 }
 0x31f   :  { %p874_p5 = scmp.ne.s32.totalorder %s1213_s5, %s873_s25  ;;  %p877_p6 = scmp.lt.u32.totalorder %s873_s25, %s1213_s5 }
 0x321   :  { %p879_p7 = pnand %p877_p6, %p874_p5 }
 0x323   :  { %882 = shalt.err (!%p879_p7)
}
 0x324   :  { %s910_s30 = smov 128   ;;  %s911_s7 = smov 8   ;;  %v759_v29 = vpop.f32.mrb[8].mxu1 }
 0x325   :  { %584 = dma.vmem_to_hbm [thread:$0]  %s579_s21, 1024, %s1213_s5, [#allocation3], %s910_s30, %s910_s30, %s911_s7   ;;  %566 = vst.msk [vmem:[#allocation4 + $0x8] sm:$0xff] %vm40_vm0, %v759_v29  ;;  %v526_v30 = vpop.f32.mrb[9].mxu1 }
 0x326   :  { %565 = vst.msk [vmem:[#allocation4] sm:$0xff] %vm40_vm0, %v526_v30  ;;  %v762_v31 = vpop.f32.mrb[10].mxu1  ;;  %s912_s9 = smov [#allocation4]  }
 0x327   :  { %568 = vst.msk [vmem:[#allocation4 + $0x18] sm:$0xff] %vm40_vm0, %v762_v31  ;;  %v536_v32 = vpop.f32.mrb[11].mxu1  ;;  %s590_s10 = sshll.u32 %s912_s9, 4  ;;  %s591_s10 = int_to_ptr.vmem [resolvable:$true] %s590_s10 }
 0x328   :  { %567 = vst.msk [vmem:[#allocation4 + $0x10] sm:$0xff] %vm40_vm0, %v536_v32  ;;  %v765_v33 = vpop.f32.mrb[12].mxu1  ;;  %s883_s5 = scalar_lea.vmem %s591_s10, 1024  ;;  %p888_p9 = scmp.lt.s32.totalorder %s591_s10, %s591_s10 }
 0x329   :  { %570 = vst.msk [vmem:[#allocation4 + $0x28] sm:$0xff] %vm40_vm0, %v765_v33  ;;  %v546_v34 = vpop.f32.mrb[13].mxu1  ;;  %p884_p8 = scmp.ne.s32.totalorder %s591_s10, %s883_s5  ;;  %p889_p10 = scmp.lt.s32.totalorder %s883_s5, %s883_s5 }
 0x32a   :  { %569 = vst.msk [vmem:[#allocation4 + $0x20] sm:$0xff] %vm40_vm0, %v546_v34  ;;  %v768_v35 = vpop.f32.mrb[14].mxu1 }
 0x32b   :  { %572 = vst.msk [vmem:[#allocation4 + $0x38] sm:$0xff] %vm40_vm0, %v768_v35  ;;  %v556_v36 = vpop.f32.mrb[15].mxu1  ;;  %p890_p11 = por %p889_p10, %p888_p9 }
 0x32c   :  { %571 = vst.msk [vmem:[#allocation4 + $0x30] sm:$0xff] %vm40_vm0, %v556_v36 }
 0x32d   :  { %p891_p12 = pnand %p890_p11, %p884_p8 }
 0x32f   :  { %894 = shalt.err (!%p891_p12)
}
 0x330   :  { %s895_s12 = scalar_lea.hbm %s1214_s6, 1024 }
 0x331   :  { %p896_p13 = scmp.ne.s32.totalorder %s1214_s6, %s895_s12  ;;  %p899_p0 = scmp.lt.u32.totalorder %s895_s12, %s1214_s6 }
 0x333   :  { %p901_p1 = pnand %p899_p0, %p896_p13 }
 0x335   :  { %904 = shalt.err (!%p901_p1)
}
 0x336   :  { %596 = dma.vmem_to_hbm [thread:$0]  %s591_s10, 1024, %s1214_s6, [#allocation5], %s910_s30, %s910_s30, %s911_s7  }
 0x337   :  { %905 = dma.done.wait [#allocation3], 1024  }
 0x338   :  { %906 = vsyncadd [#allocation3], 4294966272 }
 0x339   :  { %907 = dma.done.wait [#allocation5], 1024  }
 0x33a   :  { %908 = vsyncadd [#allocation5], 4294966272 }
 0x33b   :  { %603 = vsyncpa [#allocation3], 1 }
 0x33c   :  { %604 = vsyncpa [#allocation5], 1 }

</bundles_post_ra>
